<compile_context>
chip_gen: v5e
topology: v5e:2x2
jax: 0.10.0
libtpu: 0.0.40
codegen_flags: <defaults>
</compile_context>

<pallas_src>
import functools
import math

import jax
import jax.numpy as jnp
from jax.experimental import pallas as pl
from jax.experimental.pallas import tpu as pltpu


def _row_chunks(rows, cols, itemsize, max_chunks=8):
    """Split `rows` into up to `max_chunks` chunks of >= ~1 MiB per DMA."""
    half_bytes = rows * cols * itemsize
    target = max(1, min(max_chunks, half_bytes // (1 << 20), rows))
    chunk_rows = -(-rows // target)  # ceil
    chunks = []
    r0 = 0
    while r0 < rows:
        chunks.append((r0, min(chunk_rows, rows - r0)))
        r0 += chunk_rows
    return chunks


def _make_concat_dma_kernel(chunks, cols):
    """Kernel: 2*len(chunks) concurrent HBM->HBM DMAs, then wait on all."""

    def kernel(re_hbm, im_hbm, out_hbm, sems):
        copies = []
        for c, (r0, rlen) in enumerate(chunks):
            cp_re = pltpu.make_async_copy(
                re_hbm.at[pl.ds(r0, rlen), :],
                out_hbm.at[pl.ds(r0, rlen), pl.ds(0, cols)],
                sems.at[0, c])
            cp_im = pltpu.make_async_copy(
                im_hbm.at[pl.ds(r0, rlen), :],
                out_hbm.at[pl.ds(r0, rlen), pl.ds(cols, cols)],
                sems.at[1, c])
            cp_re.start()
            cp_im.start()
            copies.append(cp_re)
            copies.append(cp_im)
        for cp in copies:
            cp.wait()

    return kernel


@functools.partial(jax.jit, static_argnums=1)
def complex2real(x, i):
    """Pallas implementation of torch.cat((x.real, x.imag), dim=i)."""
    i = i % x.ndim
    re = jnp.real(x)
    # NOTE: torch errors on .imag of a real tensor; here a real input simply
    # yields zeros for the imaginary half.
    im = jnp.imag(x).astype(re.dtype)
    # TODO(synk): the real/imag extraction above is one extra fused XLA HBM
    # pass (2x traffic floor); Mosaic cannot consume complex dtypes and
    # lax.bitcast_convert_type rejects complex, so the de-interleave cannot be
    # folded into the kernel's input DMA.

    shape = x.shape
    rows = math.prod(shape[:i])
    d = shape[i]
    cols = d * math.prod(shape[i + 1:])

    re2 = re.reshape(rows, cols)
    im2 = im.reshape(rows, cols)

    itemsize = jnp.dtype(re.dtype).itemsize
    chunks = _row_chunks(rows, cols, itemsize)

    out2 = pl.pallas_call(
        _make_concat_dma_kernel(chunks, cols),
        out_shape=jax.ShapeDtypeStruct((rows, 2 * cols), re.dtype),
        grid_spec=pltpu.PrefetchScalarGridSpec(
            num_scalar_prefetch=0,
            grid=(1,),
            in_specs=[
                pl.BlockSpec(memory_space=pl.ANY),
                pl.BlockSpec(memory_space=pl.ANY),
            ],
            out_specs=pl.BlockSpec(memory_space=pl.ANY),
            scratch_shapes=[pltpu.SemaphoreType.DMA((2, len(chunks)))],
        ),
        compiler_params=pltpu.CompilerParams(
            dimension_semantics=("arbitrary",),
        ),
        cost_estimate=pl.CostEstimate(
            flops=0,
            transcendentals=0,
            bytes_accessed=4 * rows * cols * itemsize,
        ),
    )(re2, im2)

    return out2.reshape(shape[:i] + (2 * d,) + shape[i + 1:])


if __name__ == "__main__":
    # Complex2realLayer has no parameters; `i` is the concat axis (use i=1,
    # the channel axis of an NCHW tensor).
    i = 1
    B, C, H, W = 2, 4, 16, 16

    key = jax.random.PRNGKey(0)
    k_re, k_im = jax.random.split(key)
    x_re = jax.random.normal(k_re, (B, C, H, W), dtype=jnp.float32)
    x_im = jax.random.normal(k_im, (B, C, H, W), dtype=jnp.float32)
    x = x_re + 1j * x_im  # complex64 input, NCHW

    out = complex2real(x, i)
    out = jax.block_until_ready(out)

    # Reference check against plain-JAX concat (same semantics as torch.cat).
    ref = jnp.concatenate((x_re, x_im), axis=i)
    assert out.shape == (B, 2 * C, H, W), out.shape
    assert jnp.allclose(out, ref), "mismatch vs reference (axis=1)"

    # Extra sanity check on a different (last) axis to exercise the general
    # flattening + DMA placement path.
    out_last = jax.block_until_ready(complex2real(x, -1))
    ref_last = jnp.concatenate((x_re, x_im), axis=-1)
    assert out_last.shape == (B, C, H, 2 * W), out_last.shape
    assert jnp.allclose(out_last, ref_last), "mismatch vs reference (axis=-1)"

    print("KERNEL_OK")
</pallas_src>

<mosaic_0001>
module attributes {stable_mosaic.version = 11 : i64} {
  func.func @kernel(%arg0: i32, %arg1: memref<2x1024xf32, #tpu.memory_space<any>>, %arg2: memref<2x1024xf32, #tpu.memory_space<any>>, %arg3: memref<2x2048xf32, #tpu.memory_space<any>>, %arg4: memref<2x1x!tpu.dma_semaphore, #tpu.memory_space<semaphore_mem>>) attributes {dimension_semantics = [#tpu.dimension_semantics<arbitrary>], iteration_bounds = array<i64: 1>, scalar_prefetch = 0 : i64, scratch_operands = 1 : i64, tpu.core_type = #tpu.core_type<tc>, window_params = [{}, {}, {}]} {
    %c0_i32 = arith.constant 0 : i32
    %c0_i32_0 = arith.constant 0 : i32
    %c0_i32_1 = arith.constant 0 : i32
    %c0_i32_2 = arith.constant 0 : i32
    %0 = tpu.memref_slice %arg1[%c0_i32_1, %c0_i32_2] : memref<2x1024xf32, #tpu.memory_space<any>> -> memref<2x1024xf32, #tpu.memory_space<any>>
    %c0_i32_3 = arith.constant 0 : i32
    %c0_i32_4 = arith.constant 0 : i32
    %1 = tpu.memref_slice %arg3[%c0_i32_3, %c0_i32_4] : memref<2x2048xf32, #tpu.memory_space<any>> -> memref<2x1024xf32, #tpu.memory_space<any>>
    %2 = tpu.memref_slice %arg4[%c0_i32, %c0_i32_0] : memref<2x1x!tpu.dma_semaphore, #tpu.memory_space<semaphore_mem>> -> memref<1x1x!tpu.dma_semaphore, #tpu.memory_space<semaphore_mem>>
    %3 = tpu.memref_squeeze %2 : memref<1x1x!tpu.dma_semaphore, #tpu.memory_space<semaphore_mem>> -> memref<!tpu.dma_semaphore, #tpu.memory_space<semaphore_mem>>
    tpu.enqueue_dma source(%0 : memref<2x1024xf32, #tpu.memory_space<any>>) target(%1 : memref<2x1024xf32, #tpu.memory_space<any>>) target_semaphore(%3 : memref<!tpu.dma_semaphore, #tpu.memory_space<semaphore_mem>>)
    %c1_i32 = arith.constant 1 : i32
    %c0_i32_5 = arith.constant 0 : i32
    %c0_i32_6 = arith.constant 0 : i32
    %c0_i32_7 = arith.constant 0 : i32
    %4 = tpu.memref_slice %arg2[%c0_i32_6, %c0_i32_7] : memref<2x1024xf32, #tpu.memory_space<any>> -> memref<2x1024xf32, #tpu.memory_space<any>>
    %c0_i32_8 = arith.constant 0 : i32
    %c1024_i32 = arith.constant 1024 : i32
    %5 = tpu.memref_slice %arg3[%c0_i32_8, %c1024_i32] : memref<2x2048xf32, #tpu.memory_space<any>> -> memref<2x1024xf32, #tpu.memory_space<any>>
    %6 = tpu.memref_slice %arg4[%c1_i32, %c0_i32_5] : memref<2x1x!tpu.dma_semaphore, #tpu.memory_space<semaphore_mem>> -> memref<1x1x!tpu.dma_semaphore, #tpu.memory_space<semaphore_mem>>
    %7 = tpu.memref_squeeze %6 : memref<1x1x!tpu.dma_semaphore, #tpu.memory_space<semaphore_mem>> -> memref<!tpu.dma_semaphore, #tpu.memory_space<semaphore_mem>>
    tpu.enqueue_dma source(%4 : memref<2x1024xf32, #tpu.memory_space<any>>) target(%5 : memref<2x1024xf32, #tpu.memory_space<any>>) target_semaphore(%7 : memref<!tpu.dma_semaphore, #tpu.memory_space<semaphore_mem>>)
    %c0_i32_9 = arith.constant 0 : i32
    %c0_i32_10 = arith.constant 0 : i32
    %c0_i32_11 = arith.constant 0 : i32
    %c0_i32_12 = arith.constant 0 : i32
    %8 = tpu.memref_slice %arg1[%c0_i32_11, %c0_i32_12] : memref<2x1024xf32, #tpu.memory_space<any>> -> memref<2x1024xf32, #tpu.memory_space<any>>
    %c0_i32_13 = arith.constant 0 : i32
    %c0_i32_14 = arith.constant 0 : i32
    %9 = tpu.memref_slice %arg3[%c0_i32_13, %c0_i32_14] : memref<2x2048xf32, #tpu.memory_space<any>> -> memref<2x1024xf32, #tpu.memory_space<any>>
    %10 = tpu.memref_slice %arg4[%c0_i32_9, %c0_i32_10] : memref<2x1x!tpu.dma_semaphore, #tpu.memory_space<semaphore_mem>> -> memref<1x1x!tpu.dma_semaphore, #tpu.memory_space<semaphore_mem>>
    %11 = tpu.memref_squeeze %10 : memref<1x1x!tpu.dma_semaphore, #tpu.memory_space<semaphore_mem>> -> memref<!tpu.dma_semaphore, #tpu.memory_space<semaphore_mem>>
    tpu.wait_dma2 semaphore(%11 : memref<!tpu.dma_semaphore, #tpu.memory_space<semaphore_mem>>) src(%8 : memref<2x1024xf32, #tpu.memory_space<any>>) dst(%9 : memref<2x1024xf32, #tpu.memory_space<any>>)
    %c1_i32_15 = arith.constant 1 : i32
    %c0_i32_16 = arith.constant 0 : i32
    %c0_i32_17 = arith.constant 0 : i32
    %c0_i32_18 = arith.constant 0 : i32
    %12 = tpu.memref_slice %arg2[%c0_i32_17, %c0_i32_18] : memref<2x1024xf32, #tpu.memory_space<any>> -> memref<2x1024xf32, #tpu.memory_space<any>>
    %c0_i32_19 = arith.constant 0 : i32
    %c1024_i32_20 = arith.constant 1024 : i32
    %13 = tpu.memref_slice %arg3[%c0_i32_19, %c1024_i32_20] : memref<2x2048xf32, #tpu.memory_space<any>> -> memref<2x1024xf32, #tpu.memory_space<any>>
    %14 = tpu.memref_slice %arg4[%c1_i32_15, %c0_i32_16] : memref<2x1x!tpu.dma_semaphore, #tpu.memory_space<semaphore_mem>> -> memref<1x1x!tpu.dma_semaphore, #tpu.memory_space<semaphore_mem>>
    %15 = tpu.memref_squeeze %14 : memref<1x1x!tpu.dma_semaphore, #tpu.memory_space<semaphore_mem>> -> memref<!tpu.dma_semaphore, #tpu.memory_space<semaphore_mem>>
    tpu.wait_dma2 semaphore(%15 : memref<!tpu.dma_semaphore, #tpu.memory_space<semaphore_mem>>) src(%12 : memref<2x1024xf32, #tpu.memory_space<any>>) dst(%13 : memref<2x1024xf32, #tpu.memory_space<any>>)
    return
  }
}

</mosaic_0001>

<bundles_post_ra>
// kernel: custom-call.1
= control target key start
LH: loop header
LB: loop body
LE: loop exit
PB: predicated region body
PF: predicated region fallthrough
CT: control target
= control target key end

     0   :  { %s56_s0 = inlined_call_operand.hbm [shape: c64[2,4,16,16], index: 0, kind: input, shape index: {}]   ;;  %s57_s1 = inlined_call_operand.vmem [shape: f32[2,4,16,16], index: 1, kind: output, shape index: {}]  }
   0x1   :  { %s2_s8 = scalar_lea.hbm %s56_s0, 128 }
   0x2   :  { %3 = vsyncpa [#allocation0], 0  ;;  %s5_s9 = sshll.u32 %s2_s8, 4  ;;  %s7_s12 = sshll.u32 %s57_s1, 4  ;;  %s6_s9 = int_to_ptr.hbm [resolvable:$true] %s5_s9  ;;  %s8_s12 = int_to_ptr.vmem [resolvable:$true] %s7_s12 }
   0x3   :  { %10 = dma.hbm_to_vmem [thread:$0]  %s6_s9, 2048, %s8_s12, [#allocation0] }
   0x4   :  { %38 = dma.done.wait [#allocation0], 2048  }
   0x5   :  { %39 = vsyncadd [#allocation0], 4294965248 }
   0x6   :  { %13 = vsyncpa [#allocation0], 1 }

// kernel: custom-call
= control target key start
LH: loop header
LB: loop body
LE: loop exit
PB: predicated region body
PF: predicated region fallthrough
CT: control target
= control target key end

     0   :  { %2 = vsyncpa [#allocation0], 0  ;;  %s55_s0 = inlined_call_operand.hbm [shape: c64[2,4,16,16], index: 0, kind: input, shape index: {}]   ;;  %s56_s1 = inlined_call_operand.vmem [shape: f32[2,4,16,16], index: 1, kind: output, shape index: {}]  }
   0x1   :  { %s4_s8 = sshll.u32 %s55_s0, 4  ;;  %s6_s11 = sshll.u32 %s56_s1, 4  ;;  %s5_s8 = int_to_ptr.hbm [resolvable:$true] %s4_s8  ;;  %s7_s11 = int_to_ptr.vmem [resolvable:$true] %s6_s11 }
   0x2   :  { %9 = dma.hbm_to_vmem [thread:$0]  %s5_s8, 2048, %s7_s11, [#allocation0] }
   0x3   :  { %37 = dma.done.wait [#allocation0], 2048  }
   0x4   :  { %38 = vsyncadd [#allocation0], 4294965248 }
   0x5   :  { %12 = vsyncpa [#allocation0], 1 }

// kernel: complex2real.1
= control target key start
LH: loop header
LB: loop body
LE: loop exit
PB: predicated region body
PF: predicated region fallthrough
CT: control target
= control target key end

     0   :  { %s123_s0 = inlined_call_operand.vmem [shape: f32[2,1024], index: 0, kind: input, shape index: {}]   ;;  %s124_s1 = inlined_call_operand.vmem [shape: f32[2,1024], index: 1, kind: input, shape index: {}]   ;;  %s125_s2 = inlined_call_operand.vmem [shape: f32[2,2048], index: 2, kind: output, shape index: {}]  }
   0x1   :  { %v17_v0 = vld [vmem:[%s123_s0] sm:$0xff]  ;;  %v19_v1 = vld [vmem:[%s123_s0 + $0x8] sm:$0xff] }
   0x2   :  { %18 = vst [vmem:[%s125_s2] sm:$0xff] %v17_v0 }
   0x3   :  { %20 = vst [vmem:[%s125_s2 + $0x8] sm:$0xff] %v19_v1 }
   0x4   :  { %26 = vsyncadd [#allocation2], 256  ;;  %v39_v2 = vld [vmem:[%s124_s1] sm:$0xff]  ;;  %v41_v3 = vld [vmem:[%s124_s1 + $0x8] sm:$0xff] }
   0x5   :  { %76 = vst [vmem:[%s125_s2 + $0x10] sm:$0xff] %v39_v2 }
   0x6   :  { %77 = vst [vmem:[%s125_s2 + $0x18] sm:$0xff] %v41_v3 }
   0x7   :  { %48 = vsyncadd [#allocation2 + $0x1], 256 }
   0x8   :  { %80 = dma.done.wait [#allocation2], 256 }
   0x9   :  { %81 = vsyncadd [#allocation2], 4294967040 }
   0xa   :  { %82 = dma.done.wait [#allocation2 + $0x1], 256 }
   0xb   :  { %83 = vsyncadd [#allocation2 + $0x1], 4294967040 }
   0xc   :  { %55 = vsyncmov [#allocation2] }
   0xf   :  { %s56_s24 = vpop.sfrf %55 }
  0x10   :  { %p78_p0 = scmp.ne.s32.totalorder %s56_s24, 0 }
  0x12   :  { %60 = shalt.err (%p78_p0)  }
  0x13   :  { %62 = vsyncmov [#allocation2 + $0x1] }
  0x16   :  { %s63_s25 = vpop.sfrf %62 }
  0x17   :  { %p79_p1 = scmp.ne.s32.totalorder %s63_s25, 0 }
  0x19   :  { %67 = shalt.err (%p79_p1)  }

</bundles_post_ra>
